<compile_context>
chip_gen: v7x
topology: tpu7x:2x2x1
jax: 0.10.0
libtpu: 0.0.40
codegen_flags: <defaults>
</compile_context>

<pallas_src>
import jax
import jax.numpy as jnp
from jax.experimental import pallas as pl
from jax.experimental.pallas import tpu as pltpu

BN_EPS = 1e-5


# ----------------------------------------------------------------------------
# Kernels (feature-major layout: node dim on the 128-lane axis everywhere)
# ----------------------------------------------------------------------------
def _sage_layer_kernel(at_ref, ht_ref, invdeg_ref, wl_ref, wr_ref, b_ref,
                       o_ref, acc_ref):
    """One SAGEConv(mean) + folded-BN + ReLU layer.

    Grid = (row tiles i ["parallel"], K tiles k ["arbitrary", reduction]).
      at_ref    : (tk, tm)            bf16  A^T neighbour-count tile, block (k, i)
      ht_ref    : (n_tiles, F, tile)  bf16  resident tile-major h^T (whole array)
      invdeg_ref: (1, tm)             f32   1/in_degree, block (0, i)
      wl_ref    : (H, F)              bf16  BN-folded Wl^T
      wr_ref    : (H, F)              bf16  BN-folded Wr^T
      b_ref     : (H, 1)              f32   BN-folded bias
      o_ref     : (H, tm)             bf16  next-layer h^T tile, block (0, i)
      acc_ref   : (F, tm)             f32   aggregation accumulator (counts, unscaled)
    """
    i = pl.program_id(0)
    k = pl.program_id(1)

    @pl.when(k == 0)
    def _():
        acc_ref[...] = jnp.zeros_like(acc_ref)

    # sum^T[:, i-tile] += h^T[:, k-tile] @ A^T_counts[k-tile, i-tile]   (MXU, f32 acc)
    acc_ref[...] += jnp.dot(ht_ref[k], at_ref[...],
                            preferred_element_type=jnp.float32)

    @pl.when(k == pl.num_programs(1) - 1)
    def _():
        # Mean aggregation: scale columns by 1/in_degree in f32, then cast once.
        agg = (acc_ref[...] * invdeg_ref[...]).astype(jnp.bfloat16)
        # lin_l(agg) + lin_r(x) as two MXU dots (no sublane concat / relayout).
        y = (jnp.dot(wl_ref[...], agg, preferred_element_type=jnp.float32)
             + jnp.dot(wr_ref[...], ht_ref[i], preferred_element_type=jnp.float32)
             + b_ref[...])
        # ReLU; dropout is a no-op in eval mode.
        o_ref[...] = jnp.maximum(y, 0.0).astype(o_ref.dtype)


def _sage_head_kernel(at_ref, ht_ref, invdeg_ref, wl_ref, wr_ref, b_ref,
                      w4_ref, b4_ref, w5_ref, b5_ref, o_ref, acc_ref):
    """Third SAGE layer fused with the MLP head + log_softmax epilogue."""
    i = pl.program_id(0)
    k = pl.program_id(1)

    @pl.when(k == 0)
    def _():
        acc_ref[...] = jnp.zeros_like(acc_ref)

    acc_ref[...] += jnp.dot(ht_ref[k], at_ref[...],
                            preferred_element_type=jnp.float32)

    @pl.when(k == pl.num_programs(1) - 1)
    def _():
        agg = (acc_ref[...] * invdeg_ref[...]).astype(jnp.bfloat16)
        y = (jnp.dot(wl_ref[...], agg, preferred_element_type=jnp.float32)
             + jnp.dot(wr_ref[...], ht_ref[i], preferred_element_type=jnp.float32)
             + b_ref[...])
        h3 = jnp.maximum(y, 0.0).astype(jnp.bfloat16)                  # (H, tm)

        z1 = jnp.dot(w4_ref[...], h3,
                     preferred_element_type=jnp.float32) + b4_ref[...]  # (H, tm)
        logits = jnp.dot(w5_ref[...], z1.astype(jnp.bfloat16),
                         preferred_element_type=jnp.float32) + b5_ref[...]  # (C, tm)

        # log_softmax over the class axis (sublane axis of size n_classes).
        m = jnp.max(logits, axis=0, keepdims=True)
        z = logits - m
        lse = jnp.log(jnp.sum(jnp.exp(z), axis=0, keepdims=True))
        o_ref[...] = z - lse


# ----------------------------------------------------------------------------
# pallas_call wrapper for one layer
# ----------------------------------------------------------------------------
def _run_sage_layer(at_counts, inv_deg, hT, wlT, wrT, bT, head=None, *,
                    tile_n=512, at_buffers=2):
    n_pad = at_counts.shape[0]
    f_in = hT.shape[0]
    h_out = wlT.shape[0]
    tile = min(tile_n, n_pad)
    n_tiles = n_pad // tile
    grid = (n_tiles, n_tiles)

    # Resident tile-major h^T: (n_tiles, F, tile); the kernel indexes whole tiles
    # by leading-axis dynamic index (avoids lane-dim dynamic slicing entirely).
    ht3 = hT.reshape(f_in, n_tiles, tile).transpose(1, 0, 2)

    at_kwargs = {}
    if at_buffers != 2:
        at_kwargs["pipeline_mode"] = pl.Buffered(at_buffers)
    at_spec = pl.BlockSpec((tile, tile), lambda i, k: (k, i), **at_kwargs)

    in_specs = [
        at_spec,                                                   # A^T tile (streamed)
        pl.BlockSpec((n_tiles, f_in, tile), lambda i, k: (0, 0, 0)),  # resident h^T
        pl.BlockSpec((1, tile), lambda i, k: (0, i)),              # 1/in_degree slab
        pl.BlockSpec((h_out, f_in), lambda i, k: (0, 0)),          # Wl^T (BN-folded)
        pl.BlockSpec((h_out, f_in), lambda i, k: (0, 0)),          # Wr^T (BN-folded)
        pl.BlockSpec((h_out, 1), lambda i, k: (0, 0)),             # folded bias
    ]
    args = [at_counts, ht3, inv_deg, wlT, wrT, bT]

    flops = 2 * f_in * n_pad * n_pad + 2 * (2 * f_in) * h_out * n_pad
    bytes_accessed = (2 * at_counts.size + 2 * hT.size + 4 * inv_deg.size
                      + 2 * (wlT.size + wrT.size) + 4 * bT.size)
    transcendentals = 0

    if head is None:
        kernel = _sage_layer_kernel
        out_rows, out_dtype = h_out, jnp.bfloat16
    else:
        kernel = _sage_head_kernel
        w4T, b4T, w5T, b5T = head
        in_specs += [
            pl.BlockSpec(w4T.shape, lambda i, k: (0, 0)),
            pl.BlockSpec(b4T.shape, lambda i, k: (0, 0)),
            pl.BlockSpec(w5T.shape, lambda i, k: (0, 0)),
            pl.BlockSpec(b5T.shape, lambda i, k: (0, 0)),
        ]
        args += [w4T, b4T, w5T, b5T]
        out_rows, out_dtype = w5T.shape[0], jnp.float32
        flops += 2 * h_out * h_out * n_pad + 2 * h_out * out_rows * n_pad
        bytes_accessed += 2 * (w4T.size + w5T.size) + 4 * (b4T.size + b5T.size)
        transcendentals = (out_rows + 1) * n_pad

    bytes_accessed += out_rows * n_pad * jnp.dtype(out_dtype).itemsize

    # Working set well below v7x's 64 MiB physical VMEM (target <= 48 MiB),
    # above v5e's 16 MiB scoped default.
    working = (max(at_buffers, 2) * tile * tile * 2      # A^T tile buffers (bf16)
               + 2 * 2 * f_in * n_pad                    # resident h^T (x2 buffers)
               + 4 * f_in * tile                         # f32 accumulator scratch
               + 2 * 2 * out_rows * tile                 # output buffers
               + (1 << 20))                              # weights / bias / headroom
    vmem_limit = int(min(max(2 * working, 16 << 20), 48 << 20))

    return pl.pallas_call(
        kernel,
        out_shape=jax.ShapeDtypeStruct((out_rows, n_pad), out_dtype),
        grid_spec=pltpu.PrefetchScalarGridSpec(
            num_scalar_prefetch=0,
            grid=grid,
            in_specs=in_specs,
            out_specs=pl.BlockSpec((out_rows, tile), lambda i, k: (0, i)),
            scratch_shapes=[pltpu.VMEM((f_in, tile), jnp.float32)],
        ),
        compiler_params=pltpu.CompilerParams(
            dimension_semantics=("parallel", "arbitrary"),
            vmem_limit_bytes=vmem_limit,
        ),
        cost_estimate=pl.CostEstimate(
            flops=int(flops),
            transcendentals=int(transcendentals),
            bytes_accessed=int(bytes_accessed),
        ),
    )(*args)


# ----------------------------------------------------------------------------
# Host-side glue: adjacency counts, padding, BN folding, layout transposition
# ----------------------------------------------------------------------------
def _fold_sage_bn(wl, wr, bl, bn):
    """Fold eval-mode BatchNorm into split SAGE linears; return Wl^T, Wr^T, bias."""
    gamma, beta, rmean, rvar = bn[0], bn[1], bn[2], bn[3]
    scale = gamma * jax.lax.rsqrt(rvar + BN_EPS)                    # (H,)
    wlT = (wl * scale[None, :]).T.astype(jnp.bfloat16)              # (H, F)
    wrT = (wr * scale[None, :]).T.astype(jnp.bfloat16)              # (H, F)
    bias = (bl.reshape(-1) - rmean) * scale + beta                  # (H,)
    return wlT, wrT, bias.reshape(-1, 1).astype(jnp.float32)        # (H, 1)


def _prepare(x, edge_index, params, tile_n):
    """Padded bf16 neighbour-count A^T, f32 inv_deg, transposed x, folded weights."""
    n, emb = x.shape
    n_pad = int(tile_n * pl.cdiv(n, tile_n))
    src, dst = edge_index[0], edge_index[1]

    # A^T[j, i] = #edges (j -> i); counts are small integers, exact in bf16.
    # The 1/in_degree scale is applied in f32 INSIDE the kernel epilogue.
    # (No f32 (N_pad, N_pad) intermediate is materialised.)
    at_counts = jnp.zeros((n_pad, n_pad), jnp.bfloat16).at[src, dst].add(
        jnp.ones_like(src, dtype=jnp.bfloat16))
    deg = jnp.zeros((n_pad,), jnp.float32).at[dst].add(1.0)
    inv_deg = (1.0 / jnp.maximum(deg, 1.0)).reshape(1, n_pad)

    xT = jnp.zeros((emb, n_pad), jnp.bfloat16).at[:, :n].set(
        x.T.astype(jnp.bfloat16))

    layers = [
        _fold_sage_bn(params["wl1"], params["wr1"], params["bl1"], params["bn1"]),
        _fold_sage_bn(params["wl2"], params["wr2"], params["bl2"], params["bn2"]),
        _fold_sage_bn(params["wl3"], params["wr3"], params["bl3"], params["bn3"]),
    ]
    head = (params["w4"].T.astype(jnp.bfloat16),
            params["b4"].reshape(-1, 1).astype(jnp.float32),
            params["w5"].T.astype(jnp.bfloat16),
            params["b5"].reshape(-1, 1).astype(jnp.float32))
    return at_counts, inv_deg, xT, layers, head


def sage3bn3mlp2_forward(x, edge_index, batch, params, *, tile_n=512, at_buffers=2):
    """Full forward pass; returns (N, n_classes) log-probs."""
    del batch  # no global mean pooling in this module
    n = x.shape[0]
    at, inv_deg, hT, layers, head = _prepare(x, edge_index, params, tile_n)
    hT = _run_sage_layer(at, inv_deg, hT, *layers[0],
                         tile_n=tile_n, at_buffers=at_buffers)
    hT = _run_sage_layer(at, inv_deg, hT, *layers[1],
                         tile_n=tile_n, at_buffers=at_buffers)
    outT = _run_sage_layer(at, inv_deg, hT, *layers[2], head=head,
                           tile_n=tile_n, at_buffers=at_buffers)
    return outT[:, :n].T


# ----------------------------------------------------------------------------
# Pure-JAX reference mirroring the kernel's bf16-operand / f32-accum numerics
# ----------------------------------------------------------------------------
def reference_forward_quantized(x, edge_index, params, *, tile_n=512):
    at_counts, inv_deg, xT, layers, head = _prepare(x, edge_index, params, tile_n)
    a = at_counts.astype(jnp.float32)                   # (N_pad, N_pad), A^T counts
    bf = lambda v: v.astype(jnp.bfloat16).astype(jnp.float32)
    hT = xT.astype(jnp.float32)                         # (F, N_pad)
    for wlT, wrT, b in layers:
        aggT = bf((hT @ a) * inv_deg)                   # counts matmul, f32 deg scale
        y = (wlT.astype(jnp.float32) @ aggT
             + wrT.astype(jnp.float32) @ hT + b)
        hT = bf(jnp.maximum(y, 0.0))
    w4T, b4T, w5T, b5T = head
    z1 = bf(w4T.astype(jnp.float32) @ hT + b4T)
    logits = w5T.astype(jnp.float32) @ z1 + b5T
    outT = jax.nn.log_softmax(logits, axis=0)
    return outT[:, :x.shape[0]].T


# ----------------------------------------------------------------------------
# Parameter init (weights stored as (in_features, out_features))
# ----------------------------------------------------------------------------
def init_params(key, emb_dim, hidden_dim, n_classes):
    keys = jax.random.split(key, 20)

    def lin(k, fan_in, fan_out):
        return (jax.random.normal(k, (fan_in, fan_out), jnp.float32)
                * (1.0 / jnp.sqrt(fan_in)))

    def bn_init(k, h):
        kg, kb, km, kv = jax.random.split(k, 4)
        gamma = 1.0 + 0.1 * jax.random.normal(kg, (h,), jnp.float32)
        beta = 0.05 * jax.random.normal(kb, (h,), jnp.float32)
        rmean = 0.1 * jax.random.normal(km, (h,), jnp.float32)
        rvar = jax.random.uniform(kv, (h,), jnp.float32, 0.5, 1.5)
        return jnp.stack([gamma, beta, rmean, rvar], axis=0)

    return {
        "wl1": lin(keys[0], emb_dim, hidden_dim),
        "wr1": lin(keys[1], emb_dim, hidden_dim),
        "bl1": jnp.zeros((1, hidden_dim), jnp.float32),
        "bn1": bn_init(keys[10], hidden_dim),
        "wl2": lin(keys[2], hidden_dim, hidden_dim),
        "wr2": lin(keys[3], hidden_dim, hidden_dim),
        "bl2": 0.01 * jax.random.normal(keys[11], (1, hidden_dim), jnp.float32),
        "bn2": bn_init(keys[12], hidden_dim),
        "wl3": lin(keys[4], hidden_dim, hidden_dim),
        "wr3": lin(keys[5], hidden_dim, hidden_dim),
        "bl3": 0.01 * jax.random.normal(keys[13], (1, hidden_dim), jnp.float32),
        "bn3": bn_init(keys[14], hidden_dim),
        "w4": lin(keys[6], hidden_dim, hidden_dim),
        "b4": 0.01 * jax.random.normal(keys[7], (1, hidden_dim), jnp.float32),
        "w5": lin(keys[8], hidden_dim, n_classes),
        "b5": 0.01 * jax.random.normal(keys[9], (1, n_classes), jnp.float32),
    }


if __name__ == "__main__":
    key = jax.random.PRNGKey(0)
    k_x, k_e1, k_e2, k_p = jax.random.split(key, 4)

    num_nodes = 200     # nodes in the graph batch
    emb_dim = 8         # input node feature dim
    hidden_dim = 32
    n_classes = 2
    num_edges = 600
    tile_n = 128        # small tiles here so the demo exercises a (2, 2) tiled grid;
                        # production default is tile_n=512 (see _run_sage_layer)

    x = jax.random.normal(k_x, (num_nodes, emb_dim), jnp.float32)
    src = jax.random.randint(k_e1, (num_edges,), 0, num_nodes)
    dst = jax.random.randint(k_e2, (num_edges,), 0, num_nodes)
    edge_index = jnp.stack([src, dst], axis=0)          # (2, E)
    batch = jnp.zeros((num_nodes,), jnp.int32)          # unused (no global pool)

    params = init_params(k_p, emb_dim, hidden_dim, n_classes)

    out = sage3bn3mlp2_forward(x, edge_index, batch, params, tile_n=tile_n)
    out = jax.block_until_ready(out)
    assert out.shape == (num_nodes, n_classes)

    ref = reference_forward_quantized(x, edge_index, params, tile_n=tile_n)
    max_err = float(jnp.max(jnp.abs(out - ref)))
    assert max_err < 1e-2, f"max abs err vs reference: {max_err}"

    print("KERNEL_OK")
</pallas_src>

<mosaic_0001>
module attributes {stable_mosaic.version = 11 : i64} {
  func.func @_sage_layer_kernel(%arg0: i32, %arg1: i32, %arg2: memref<128x128xbf16, #tpu.memory_space<vmem>>, %arg3: memref<2x8x128xbf16, #tpu.memory_space<vmem>>, %arg4: memref<1x128xf32, #tpu.memory_space<vmem>>, %arg5: memref<32x8xbf16, #tpu.memory_space<vmem>>, %arg6: memref<32x8xbf16, #tpu.memory_space<vmem>>, %arg7: memref<32x1xf32, #tpu.memory_space<vmem>>, %arg8: memref<32x128xbf16, #tpu.memory_space<vmem>>, %arg9: memref<8x128xf32, #tpu.memory_space<vmem>>) attributes {dimension_semantics = [#tpu.dimension_semantics<parallel>, #tpu.dimension_semantics<arbitrary>], iteration_bounds = array<i64: 2, 2>, scalar_prefetch = 0 : i64, scratch_operands = 1 : i64, tpu.core_type = #tpu.core_type<tc>, window_params = [{transform_indices = @transform_0, window_bounds = array<i64: 128, 128>}, {pipeline_mode = #tpu.pipeline_mode<synchronous>, transform_indices = @transform_1, window_bounds = array<i64: 2, 8, 128>}, {transform_indices = @transform_2, window_bounds = array<i64: 1, 128>}, {pipeline_mode = #tpu.pipeline_mode<synchronous>, transform_indices = @transform_3, window_bounds = array<i64: 32, 8>}, {pipeline_mode = #tpu.pipeline_mode<synchronous>, transform_indices = @transform_4, window_bounds = array<i64: 32, 8>}, {pipeline_mode = #tpu.pipeline_mode<synchronous>, transform_indices = @transform_5, window_bounds = array<i64: 32, 1>}, {transform_indices = @transform_6, window_bounds = array<i64: 32, 128>}]} {
    %c0_i32 = arith.constant 0 : i32
    %0 = arith.cmpi eq, %arg1, %c0_i32 : i32
    %1 = arith.extui %0 : i1 to i32
    %c0_i32_0 = arith.constant 0 : i32
    %2 = arith.cmpi ne, %1, %c0_i32_0 : i32
    scf.if %2 {
      %cst_9 = arith.constant 0.000000e+00 : f32
      %14 = vector.broadcast %cst_9 : f32 to vector<8x128xf32>
      %c0_10 = arith.constant 0 : index
      %c0_11 = arith.constant 0 : index
      %15 = vector.load %arg9[%c0_10, %c0_11] : memref<8x128xf32, #tpu.memory_space<vmem>>, vector<8x128xf32>
      tpu.vector_store %arg9[%c0_10, %c0_11], %14 {strides = array<i32>} : memref<8x128xf32, #tpu.memory_space<vmem>>, vector<8x128xf32>,
    } else {
    }
    %c0 = arith.constant 0 : index
    %c0_1 = arith.constant 0 : index
    %3 = vector.load %arg9[%c0, %c0_1] : memref<8x128xf32, #tpu.memory_space<vmem>>, vector<8x128xf32>
    %4 = arith.index_cast %arg1 : i32 to index
    %c0_2 = arith.constant 0 : index
    %c0_3 = arith.constant 0 : index
    %5 = vector.load %arg3[%4, %c0_2, %c0_3] : memref<2x8x128xbf16, #tpu.memory_space<vmem>>, vector<1x8x128xbf16>
    %6 = vector.shape_cast %5 : vector<1x8x128xbf16> to vector<8x128xbf16>
    %c0_4 = arith.constant 0 : index
    %c0_5 = arith.constant 0 : index
    %7 = vector.load %arg2[%c0_4, %c0_5] : memref<128x128xbf16, #tpu.memory_space<vmem>>, vector<128x128xbf16>
    %cst = arith.constant dense<0.000000e+00> : vector<8x128xf32>
    %8 = tpu.matmul %6, %7, %cst {dimension_numbers = #tpu.dot_dimension_numbers<[1], [0], [0], [1], [0, 0, 1, 1], [], []>} : vector<8x128xbf16>, vector<128x128xbf16>, vector<8x128xf32> -> vector<8x128xf32>
    %9 = arith.addf %3, %8 : vector<8x128xf32>
    %c0_6 = arith.constant 0 : index
    %c0_7 = arith.constant 0 : index
    %10 = vector.load %arg9[%c0_6, %c0_7] : memref<8x128xf32, #tpu.memory_space<vmem>>, vector<8x128xf32>
    tpu.vector_store %arg9[%c0_6, %c0_7], %9 {strides = array<i32>} : memref<8x128xf32, #tpu.memory_space<vmem>>, vector<8x128xf32>,
    %c1_i32 = arith.constant 1 : i32
    %11 = arith.cmpi eq, %arg1, %c1_i32 : i32
    %12 = arith.extui %11 : i1 to i32
    %c0_i32_8 = arith.constant 0 : i32
    %13 = arith.cmpi ne, %12, %c0_i32_8 : i32
    scf.if %13 {
      %c0_9 = arith.constant 0 : index
      %c0_10 = arith.constant 0 : index
      %14 = vector.load %arg9[%c0_9, %c0_10] : memref<8x128xf32, #tpu.memory_space<vmem>>, vector<8x128xf32>
      %c0_11 = arith.constant 0 : index
      %c0_12 = arith.constant 0 : index
      %15 = vector.load %arg4[%c0_11, %c0_12] : memref<1x128xf32, #tpu.memory_space<vmem>>, vector<1x128xf32>
      %16 = vector.broadcast %15 : vector<1x128xf32> to vector<8x128xf32>
      %17 = arith.mulf %14, %16 : vector<8x128xf32>
      %18 = arith.truncf %17 : vector<8x128xf32> to vector<8x128xbf16>
      %c0_13 = arith.constant 0 : index
      %c0_14 = arith.constant 0 : index
      %19 = vector.load %arg5[%c0_13, %c0_14] : memref<32x8xbf16, #tpu.memory_space<vmem>>, vector<32x8xbf16>
      %cst_15 = arith.constant dense<0.000000e+00> : vector<32x128xf32>
      %20 = tpu.matmul %19, %18, %cst_15 {dimension_numbers = #tpu.dot_dimension_numbers<[1], [0], [0], [1], [0, 0, 1, 1], [], []>} : vector<32x8xbf16>, vector<8x128xbf16>, vector<32x128xf32> -> vector<32x128xf32>
      %c0_16 = arith.constant 0 : index
      %c0_17 = arith.constant 0 : index
      %21 = vector.load %arg6[%c0_16, %c0_17] : memref<32x8xbf16, #tpu.memory_space<vmem>>, vector<32x8xbf16>
      %22 = arith.index_cast %arg0 : i32 to index
      %c0_18 = arith.constant 0 : index
      %c0_19 = arith.constant 0 : index
      %23 = vector.load %arg3[%22, %c0_18, %c0_19] : memref<2x8x128xbf16, #tpu.memory_space<vmem>>, vector<1x8x128xbf16>
      %24 = vector.shape_cast %23 : vector<1x8x128xbf16> to vector<8x128xbf16>
      %cst_20 = arith.constant dense<0.000000e+00> : vector<32x128xf32>
      %25 = tpu.matmul %21, %24, %cst_20 {dimension_numbers = #tpu.dot_dimension_numbers<[1], [0], [0], [1], [0, 0, 1, 1], [], []>} : vector<32x8xbf16>, vector<8x128xbf16>, vector<32x128xf32> -> vector<32x128xf32>
      %26 = arith.addf %20, %25 : vector<32x128xf32>
      %c0_21 = arith.constant 0 : index
      %c0_22 = arith.constant 0 : index
      %27 = vector.load %arg7[%c0_21, %c0_22] : memref<32x1xf32, #tpu.memory_space<vmem>>, vector<32x1xf32>
      %28 = vector.broadcast %27 : vector<32x1xf32> to vector<32x128xf32>
      %29 = arith.addf %26, %28 : vector<32x128xf32>
      %cst_23 = arith.constant 0.000000e+00 : f32
      %30 = vector.broadcast %cst_23 : f32 to vector<32x128xf32>
      %31 = arith.maximumf %29, %30 : vector<32x128xf32>
      %32 = arith.truncf %31 : vector<32x128xf32> to vector<32x128xbf16>
      %c0_24 = arith.constant 0 : index
      %c0_25 = arith.constant 0 : index
      %33 = vector.load %arg8[%c0_24, %c0_25] : memref<32x128xbf16, #tpu.memory_space<vmem>>, vector<32x128xbf16>
      tpu.vector_store %arg8[%c0_24, %c0_25], %32 {strides = array<i32>} : memref<32x128xbf16, #tpu.memory_space<vmem>>, vector<32x128xbf16>,
    } else {
    }
    return
  }
  func.func @transform_0(%arg0: i32, %arg1: i32) -> (i32, i32) {
    %c0_i32 = arith.constant 0 : i32
    return %arg1, %arg0 : i32, i32
  }
  func.func @transform_1(%arg0: i32, %arg1: i32) -> (i32, i32, i32) {
    %c0_i32 = arith.constant 0 : i32
    %c0_i32_0 = arith.constant 0 : i32
    %c0_i32_1 = arith.constant 0 : i32
    %c0_i32_2 = arith.constant 0 : i32
    return %c0_i32, %c0_i32_0, %c0_i32_1 : i32, i32, i32
  }
  func.func @transform_2(%arg0: i32, %arg1: i32) -> (i32, i32) {
    %c0_i32 = arith.constant 0 : i32
    %c0_i32_0 = arith.constant 0 : i32
    return %c0_i32, %arg0 : i32, i32
  }
  func.func @transform_3(%arg0: i32, %arg1: i32) -> (i32, i32) {
    %c0_i32 = arith.constant 0 : i32
    %c0_i32_0 = arith.constant 0 : i32
    %c0_i32_1 = arith.constant 0 : i32
    return %c0_i32, %c0_i32_0 : i32, i32
  }
  func.func @transform_4(%arg0: i32, %arg1: i32) -> (i32, i32) {
    %c0_i32 = arith.constant 0 : i32
    %c0_i32_0 = arith.constant 0 : i32
    %c0_i32_1 = arith.constant 0 : i32
    return %c0_i32, %c0_i32_0 : i32, i32
  }
  func.func @transform_5(%arg0: i32, %arg1: i32) -> (i32, i32) {
    %c0_i32 = arith.constant 0 : i32
    %c0_i32_0 = arith.constant 0 : i32
    %c0_i32_1 = arith.constant 0 : i32
    return %c0_i32, %c0_i32_0 : i32, i32
  }
  func.func @transform_6(%arg0: i32, %arg1: i32) -> (i32, i32) {
    %c0_i32 = arith.constant 0 : i32
    %c0_i32_0 = arith.constant 0 : i32
    return %c0_i32, %arg0 : i32, i32
  }
}

</mosaic_0001>

<bundles_post_ra>
// kernel: tpu_custom_call.1
= control target key start
LH: loop header
LB: loop body
LE: loop exit
PB: predicated region body
PF: predicated region fallthrough
CT: control target
= control target key end

     0   :  { %s1474_s0 = inlined_call_operand.hbm [shape: bf16[256,256], index: 0, kind: input, shape index: {}]   ;;  %s1475_s1 = inlined_call_operand.vmem [shape: bf16[2,8,128], index: 1, kind: input, shape index: {}]   ;;  %s1476_s2 = inlined_call_operand.vmem [shape: f32[1,256], index: 2, kind: input, shape index: {}]   ;;  %s1477_s3 = inlined_call_operand.vmem [shape: bf16[32,8], index: 3, kind: input, shape index: {}]   ;;  %s1478_s4 = inlined_call_operand.vmem [shape: bf16[32,8], index: 4, kind: input, shape index: {}]   ;;  %s1479_s5 = inlined_call_operand.vmem [shape: f32[32,1], index: 5, kind: input, shape index: {}]   ;;  %s1480_s6 = inlined_call_operand.hbm [shape: bf16[32,256], index: 6, kind: output, shape index: {}]  }
   0x1   :  { %1486 = sst [smem:[#allocation12_spill]] %s1479_s5 }
   0x2   :  { %1487 = sst [smem:[#allocation13_spill]] %s1480_s6 }
   0x3   :  { %11 = vsyncpa [#allocation4], 0 }
   0x4   :  { %13 = vsyncpa [#allocation4 + $0x1], 0 }
   0x5   :  { %14 = vsyncpa [#allocation5], 0 }
   0x6   :  { %16 = vsyncpa [#allocation5 + $0x1], 0  ;;  %s1180_s21 = smov 0   ;;  %s1182_s22 = smov 0  }
   0x7   :  { %s1184_s23 = smov 0   ;;  %s1186_s24 = smov 0  }
   0x8   :  { %s1188_s25 = smov 0   ;;  %s1190_s26 = smov 0  }
   0x9   :  { %s1192_s27 = smov 0   ;;  %s1194_s28 = smov 0  }
   0xa   :  { %s1196_s29 = smov 0   ;;  %s1198_s30 = smov 0  }
   0xb   :  { %s1200_s7 = smov 0  }
   0xc LB: > { %s744_s8 = sadd.s32 4294967295, %s1131_s7   ;;  %s745_s9 = sadd.s32 4294967294, %s1131_s7   ;;  %s1131_s7 = sphi %s1200_s7, %s22_s7   ;;  %s1127_s30 = sphi %s1198_s30, %s1513_s30   ;;  %s1123_s29 = sphi %s1196_s29, %s1512_s29   ;;  %s1119_s28 = sphi %s1194_s28, %s1511_s28   ;;  %s1115_s27 = sphi %s1192_s27, %s1510_s27   ;;  %s1111_s26 = sphi %s1190_s26, %s1509_s26   ;;  %s1107_s25 = sphi %s1188_s25, %s1508_s25   ;;  %s1103_s24 = sphi %s1186_s24, %s1507_s24   ;;  %s1099_s23 = sphi %s1184_s23, %s1506_s23   ;;  %s1095_s22 = sphi %s1182_s22, %s1505_s22   ;;  %s1091_s21 = sphi %s1180_s21, %s1504_s21  }
   0xd   : > { %s31_s10 = sadd.s32 1, %s1123_s29  ;;  %s34_s11 = sadd.s32 1, %s1127_s30 }
   0xe   : > { %p32_p0 = scmp.ge.s32.totalorder %s31_s10, 2  ;;  %s43_s12 = sadd.s32 1, %s1111_s26 }
   0xf   : > { %p50_p1 = scmp.ne.s32.totalorder %s1111_s26, %s1107_s25  ;;  %p51_p2 = scmp.eq.s32.totalorder %s1131_s7, 0 }
  0x10   : > { %s1515_s10 = smov (%p32_p0, %s31_s10), 0  ;;  %s1517_s11 = smov (!%p32_p0, %s34_s11), %s1127_s30 }
  0x11   : > { %1488 = sst [smem:[#allocation9_spill]] %s1515_s10  ;;  %s38_s13 = ssub.s32 %s1123_s29, %s1515_s10 }
  0x12   : > { %p1246_p3 = por %p51_p2, %p50_p1  ;;  %p36_p4 = scmp.ge.s32.totalorder %s1517_s11, 2 }
  0x13   : > { %p56_p5 = scmp.ne.s32.totalorder %s1107_s25, %s1103_s24  ;;  %p57_p6 = scmp.eq.s32.totalorder %s744_s8, 0 }
  0x14   : > { %s179_s15 = sadd.s32 1, %s1099_s23  ;;  %s1519_s11 = smov (%p36_p4, %s1517_s11), 0 }
  0x15   : > { %1490 = sst [smem:[#allocation10_spill]] %s1519_s11  ;;  %p1254_p7 = por %p57_p6, %p56_p5 }
  0x16   : > { %p189_p8 = scmp.ne.s32.totalorder %s1099_s23, %s1095_s22  ;;  %s39_s17 = ssub.s32 %s1127_s30, %s1519_s11 }
  0x17   : > { %p190_p9 = scmp.eq.s32.totalorder %s744_s8, 3  ;;  %s40_s18 = sor.u32 %s39_s17, %s38_s13 }
  0x18   : > { %p177_p10 = scmp.eq.s32.totalorder %s39_s17, 0  ;;  %p41_p11 = scmp.eq.s32.totalorder %s40_s18, 0 }
  0x19   : > { %p1262_p12 = por %p190_p9, %p189_p8  ;;  %p195_p13 = scmp.ne.s32.totalorder %s1095_s22, %s1091_s21 }
  0x1a   : > { %s1267_s20 = scalar_select %p177_p10, %s1099_s23, %s179_s15  }
  0x1b   : > { %s1492_s19 = scalar_select %p1262_p12, 1, 0 }
  0x1c   : > { %1493 = sst [smem:[#allocation11_spill]] %s1267_s20  ;;  %p196_p0 = scmp.eq.s32.totalorder %s745_s9, 3 }
  0x1d   : > { %s1270_s24 = scalar_select %p41_p11, %s1111_s26, %s43_s12  }
  0x1e   : > { %p865_p1 = scmp.lt.s32.totalorder %s1131_s7, 4  ;;  %p1275_p2 = por %p196_p0, %p195_p13 }
  0x1f   : > { %s228_s8 = sand.u32 1, %s1111_s26   ;;  %s784_s17 = sshll.u32 %s1123_s29, 5 }
  0x20   : > { %s1494_s10 = scalar_select %p1275_p2, 1, 0 }
  0x21   : > { %s748_s13 = sshll.u32 %s228_s8, 6  ;;  %s238_s18 = sadd.s32 %s1127_s30, %s784_s17 }
  0x22   : > { %s232_s11 = scalar_lea.vmem [#allocation3], %s748_s13  ;;  %s751_s5 = sshll.u32 %s238_s18, 6 }
  0x23   : > { %s241_s6 = sshll.u32 %s232_s11, 4  ;;  %s1287_s12 = scalar_lea.hbm %s1474_s0, %s751_s5  ;;  %s1282_s6 = int_to_ptr.vmem [resolvable:$true] %s241_s6 }
  0x24   : > { %p1291_p4 = pnand %p865_p1, %p1246_p3  ;;  %s1295_s11 = scalar_lea.sflag [#allocation4], %s228_s8 }
  0x25   : > { %s979_s13 = scalar_lea.hbm %s1287_s12, 1024  ;;  %s984_s20 = scalar_lea.hbm %s1474_s0, 4096 }
  0x26   : > { %p980_p5 = scmp.ne.s32.totalorder %s1287_s12, %s979_s13  ;;  %p981_p6 = pneg %p1291_p4 }
  0x27   : > { %p985_p3 = scmp.lt.u32.totalorder %s1287_s12, %s1474_s0  ;;  %p986_p10 = scmp.lt.u32.totalorder %s984_s20, %s979_s13 }
  0x28   : > { %p982_p8 = pnand %p981_p6, %p980_p5  ;;  %p988_p13 = scmp.lt.u32.totalorder %s979_s13, %s1287_s12 }
  0x29   : > { %p987_p11 = por %p986_p10, %p985_p3 }
  0x2a   : > { %p983_p9 = pneg %p982_p8 }
  0x2b   : > { %p989_p0 = por %p988_p13, %p987_p11 }
  0x2d   : > { %p990_p1 = pnand %p989_p0, %p983_p9 }
  0x2f   : > { %993 = shalt.err (!%p990_p1)
}
  0x30   : > { %s994_s8 = scalar_lea.vmem %s1282_s6, 1024  ;;  %s1133_s15 = smov [#allocation3]  }
  0x31   : > { %p995_p5 = scmp.ne.s32.totalorder %s1282_s6, %s994_s8  ;;  %s999_s5 = sshll.u32 %s1133_s15, 4  ;;  %s1000_s5 = int_to_ptr.vmem [resolvable:$false] %s999_s5 }
  0x32   : > { %s1001_s14 = scalar_lea.vmem %s1000_s5, 2048  ;;  %p1002_p12 = scmp.lt.s32.totalorder %s1282_s6, %s1000_s5 }
  0x33   : > { %p997_p8 = pnand %p995_p5, %p981_p6  ;;  %p1003_p3 = scmp.lt.s32.totalorder %s1001_s14, %s994_s8 }
  0x35   : > { %p998_p2 = pneg %p997_p8  ;;  %p1004_p10 = por %p1003_p3, %p1002_p12 }
  0x37   : > { %p1005_p11 = pnand %p1004_p10, %p998_p2 }
  0x39   : > { %1008 = shalt.err (!%p1005_p11)
}
  0x3a   : > { %s1134_s13 = smov 128   ;;  %s1135_s20 = smov 64  }
  0x3b   : > { %s1136_s17 = smov 4   ;;  %p752_p6 = scmp.ge.s32.totalorder %s1131_s7, 1 }
  0x3c   : > { %860 = dma.hbm_to_vmem [thread:$0]  (!%p1291_p4), %s1287_s12, 1024, %s1282_s6, %s1295_s11, %s1134_s13, %s1135_s20, %s1136_s17  }
  0x3d   : > { %p255_p9 = scmp.lt.s32.totalorder %s1131_s7, 5 }
  0x3f   : > { %p256_p13 = pnand %p752_p6, %p255_p9 }
  0x40   : > { %s261_s18 = sand.u32 (!%p256_p13), 1, %s1107_s25  }
  0x41   : > { %259 = sbr.rel (%p256_p13) target bundleno = 598 (0x256), region = 44  ;;  %s753_s8 = sshll.u32 (!%p256_p13), %s261_s18, 6 }
  0x42   : > { %s262_s15 = scalar_lea.sflag (!%p256_p13), [#allocation4], %s261_s18  ;;  %s1326_s5 = scalar_lea.vmem (!%p256_p13), [#allocation3], %s753_s8 }
  0x48   : > { %1082 = dma.done.wait (%p1254_p7), %s262_s15, 1024  }
  0x49   : > { %1084 = vsyncadd (%p1254_p7), %s262_s15, 4294966272  ;;  %s294_s6 = sand.u32 1, %s1095_s22   ;;  %p298_p12 = scmp.lt.s32.totalorder %s1119_s28, 1 }
  0x4a   : > { %s754_s12 = sshll.u32 %s294_s6, 4  ;;  %p755_p2 = scmp.ne.s32.totalorder %s1115_s27, 0 }
  0x4b   : > { %s1337_s9 = scalar_select %p298_p12, %s1119_s28, 1 }
  0x4c   : > { %s1343_s20 = scalar_lea.vmem [#allocation6], %s754_s12  ;;  %305 = sbr.rel (%p755_p2) target bundleno = 83 (0x53), region = 52  ;;  %v1137_v0 = vmov (!%p755_p2), 0.0  }
  0x4d   : > { %s300_s13 = scalar_lea.vmem %s1476_s2, %s1337_s9  ;;  %306 = vst [vmem:[#allocation2] sm:$0xff] (!%p755_p2), %v1137_v0 }
  0x53 PF: > { %v965_v1 = vld [vmem:[%s1326_s5] sm:$0xff]   ;;  %v1138_v2 = vmov 0.0   ;;  %v966_v3 = vld [vmem:[%s1326_s5 + $0x8] sm:$0xff]   ;;  %vm1139_vm0 = vmmov 0   ;;  %v967_v4 = vld [vmem:[%s1326_s5 + $0x10] sm:$0xff]   ;;  %s756_s16 = sshll.u32 %s1115_s27, 2 }
  0x54   : > { %815 = vmatprep.subr.bf16.mxu0 %v1138_v2  ;;  %831 = vmatprep.mubr.msk.bf16.mxu0 %vm1139_vm0, %v1138_v2  ;;  %v968_v5 = vld [vmem:[%s1326_s5 + $0x18] sm:$0xff]   ;;  %v969_v6 = vld [vmem:[%s1326_s5 + $0x20] sm:$0xff]   ;;  %v970_v7 = vld [vmem:[%s1326_s5 + $0x28] sm:$0xff]   ;;  %s309_s8 = scalar_lea.vmem %s1475_s1, %s756_s16  ;;  %p765_p7 = scmp.ne.s32.totalorder %s1115_s27, 1 }
  0x55   : > { %816 = vmatpush3.bf16.msra.mxu0 %v965_v1  ;;  %v971_v8 = vld [vmem:[%s1326_s5 + $0x30] sm:$0xff]   ;;  %v972_v9 = vld [vmem:[%s1326_s5 + $0x38] sm:$0xff]   ;;  %s767_s15 = sshll.u32 (!%p765_p7), %s1119_s28, 2  ;;  %vm459_vm1 = vcmask (!%p765_p7), 1043456   ;;  %vm452_vm2 = vcmask (!%p765_p7), 64512   ;;  %v976_v21 = vld [vmem:[%s1478_s4 + $0x8] sm:$0xff] (!%p765_p7)  }
  0x56   : > { %817 = vmatprep.subr.bf16.mxu0 %v1138_v2  ;;  %v310_v10 = vld [vmem:[%s309_s8] sm:$0xf]  ;;  %s440_s18 = scalar_lea.vmem (!%p765_p7), %s1475_s1, %s767_s15  ;;  %v978_v27 = vld [vmem:[%s1477_s3 + $0x8] sm:$0xff] (!%p765_p7)   ;;  %s1496_s14 = sld [smem:[#allocation12_spill]] (!%p765_p7)  ;;  %v1140_v30 = vmov (!%p765_p7), 0  }
  0x57   : > { %v307_v11 = vld [vmem:[#allocation2] sm:$0xff]  ;;  %974 = vset.pattern.permute.xlu1 (!%p765_p7), %v1140_v30  ;;  %973 = vset.pattern.permute.xlu0 (!%p765_p7), %v1140_v30 }
  0x58   : > { %v766_v18 = vld [vmem:[%s300_s13] ss:$0 sm:$0xff] (!%p765_p7) }
  0x59   : > { %818 = vmatpush3.bf16.msra.mxu0 %v966_v3  ;;  %v975_v19 = vld [vmem:[%s1478_s4] sm:$0xff] (!%p765_p7)  }
  0x5a   : > { %819 = vmatprep.subr.bf16.mxu0 %v1138_v2  ;;  %v441_v22 = vld [vmem:[%s440_s18] sm:$0xf] (!%p765_p7)  ;;  %837 = vmatprep.mubr.msk.bf16.mxu1 (!%p765_p7), %vm452_vm2, %v975_v19 }
  0x5b   : > { %851 = vmatprep.subr.msk.bf16.mxu1 (!%p765_p7), %vm459_vm1, %v441_v22  ;;  %v461_v23 = vsel (!%p765_p7), %vm459_vm1, %v441_v22, 0  ;;  %v977_v25 = vld [vmem:[%s1477_s3] sm:$0xff] (!%p765_p7)  }
  0x5c   : > { %836 = vmatpush3.bf16.msra.mxu1 (!%p765_p7), %v461_v23  ;;  %v582_v28 = vld [vmem:[%s1496_s14 + $0x10] sm:$0xff] (!%p765_p7)  ;;  %v580_v29 = vld [vmem:[%s1496_s14] sm:$0xff] (!%p765_p7)  ;;  %v583_v31 = vld [vmem:[%s1496_s14 + $0x18] sm:$0xff] (!%p765_p7) }
  0x5d   : > { %820 = vmatpush3.bf16.msra.mxu0 %v967_v4  ;;  %596 = vperm.xlu1 (!%p765_p7), %974, %v582_v28   ;;  %v581_v32 = vld [vmem:[%s1496_s14 + $0x8] sm:$0xff] (!%p765_p7) }
  0x5e   : > { %821 = vmatprep.subr.bf16.mxu0 %v1138_v2  ;;  %586 = vperm.xlu0 (!%p765_p7), %973, %v580_v29  }
  0x5f   : > { %838 = vmatmul.mubr.msk.bf16.vlgmr.msra.gmra.mrb[0].mxu1 (!%p765_p7), %vm452_vm2, %v976_v21 }
  0x61   : > { %822 = vmatpush3.bf16.msra.mxu0 %v968_v5  ;;  %601 = vperm.xlu1 (!%p765_p7), %974, %v583_v31  }
  0x62   : > { %823 = vmatprep.subr.bf16.mxu0 %v1138_v2  ;;  %591 = vperm.xlu0 (!%p765_p7), %973, %v581_v32  }
  0x65   : > { %824 = vmatpush3.bf16.msra.mxu0 %v969_v6 }
  0x66   : > { %825 = vmatprep.subr.bf16.mxu0 %v1138_v2 }
  0x69   : > { %826 = vmatpush3.bf16.msra.mxu0 %v970_v7 }
  0x6a   : > { %827 = vmatprep.subr.bf16.mxu0 %v1138_v2 }
  0x6d   : > { %828 = vmatpush3.bf16.msra.mxu0 %v971_v8 }
  0x6e   : > { %829 = vmatprep.subr.bf16.mxu0 %v1138_v2 }
  0x71   : > { %830 = vmatpush3.bf16.msra.mxu0 %v972_v9 }
  0x74   : > { %832 = vmatmul.mubr.bf16.vlgmr.msra.gmra.mrb[0].mxu0 %v310_v10 }
  0x75   : > { %843 = vmatprep.mubr.msk.bf16.mxu0 (!%p765_p7), %vm452_vm2, %v977_v25 }
  0xdc   : > { %v597_v33 = vpop.permute.xlu1 (!%p765_p7), %596 }
  0xdd   : > { %v587_v35 = vpop.permute.xlu0 (!%p765_p7), %586 }
  0xe0   : > { %v602_v47 = vpop.permute.xlu1 (!%p765_p7), %601 }
  0xe1   : > { %v592_v50 = vpop.permute.xlu0 (!%p765_p7), %591 }
 0x132   : > { %v839_v34 = vpop.f32.mrb[0].mxu1 (!%p765_p7) }
 0x133   : > { %v497_v36 = vpop.f32.mrb[1].mxu1 (!%p765_p7) }
 0x134   : > { %v840_v37 = vpop.f32.mrb[2].mxu1 (!%p765_p7) }
 0x135   : > { %v500_v40 = vpop.f32.mrb[3].mxu1 (!%p765_p7) }
 0x144   : > { %420 = sbr.rel (%p765_p7) target bundleno = 570 (0x23a), region = 56 }
 0x147   : > { %v409_v12 = vpop.f32.mrb[0].mxu0 }
 0x148   : > { %v415_v13 = vadd.f32 %v409_v12, %v307_v11  ;;  %v833_v14 = vpop.f32.mrb[1].mxu0 }
 0x149   : > { %v412_v15 = vpop.f32.mrb[2].mxu0 }
 0x14a   : > { %416 = vst [vmem:[#allocation2] sm:$0xff] %v415_v13  ;;  %v834_v16 = vpop.f32.mrb[3].mxu0 }
 0x151   : > { %v421_v17 = vld [vmem:[#allocation2] sm:$0xff] }
 0x152   : > { %v429_v20 = vmul.f32 %v766_v18, %v421_v17 }
 0x154   : > { %v430_v24 = vpack.c.bf16 %v429_v20, %v429_v20 }
 0x156   : > { %852 = vmatprep.subr.msk.bf16.mxu0 %vm459_vm1, %v430_v24  ;;  %v529_v26 = vsel %vm459_vm1, %v430_v24, 0 }
 0x157   : > { %842 = vmatpush3.bf16.msra.mxu0 %v529_v26 }
 0x15a   : > { %844 = vmatmul.mubr.msk.bf16.vlgmr.msra.gmra.mrb[0].mxu0 %vm452_vm2, %v978_v27 }
 0x22d   : > { %v845_v38 = vpop.f32.mrb[0].mxu0 }
 0x22e   : > { %v574_v39 = vadd.f32 %v845_v38, %v839_v34  ;;  %v565_v41 = vpop.f32.mrb[1].mxu0 }
 0x22f   : > { %v566_v42 = vadd.f32 %v565_v41, %v497_v36  ;;  %v846_v43 = vpop.f32.mrb[2].mxu0 }
 0x230   : > { %v606_v44 = vadd.f32 %v597_v33, %v574_v39  ;;  %v577_v45 = vadd.f32 %v846_v43, %v840_v37  ;;  %v568_v46 = vpop.f32.mrb[3].mxu0 }
 0x231   : > { %v604_v48 = vadd.f32 %v587_v35, %v566_v42  ;;  %v569_v49 = vadd.f32 %v568_v46, %v500_v40 }
 0x232   : > { %v607_v51 = vadd.f32 %v602_v47, %v577_v45  ;;  %v610_v53 = vmax.f32 %v606_v44, 0.0 }
 0x233   : > { %v605_v52 = vadd.f32 %v592_v50, %v569_v49  ;;  %v608_v55 = vmax.f32 %v604_v48, 0.0 }
 0x234   : > { %v611_v54 = vmax.f32 %v607_v51, 0.0 }
 0x235   : > { %v609_v56 = vmax.f32 %v605_v52, 0.0 }
 0x236   : > { %v797_v57 = vpack.c.bf16 %v611_v54, %v610_v53 }
 0x237   : > { %v792_v58 = vpack.c.bf16 %v609_v56, %v608_v55 }
 0x238   : > { %799 = vst [vmem:[%s1343_s20 + $0x8] sm:$0xff] %v797_v57  }
 0x239   : > { %793 = vst [vmem:[%s1343_s20] sm:$0xff] %v792_v58  }
 0x23a PF: > { %s781_s13 = sshll.u32 %s1119_s28, 6  ;;  %s1497_s12 = sld [smem:[#allocation13_spill]] }
 0x23b   : > { %s645_s16 = sshll.u32 %s1343_s20, 4  ;;  %s1413_s17 = scalar_lea.sflag [#allocation5], %s294_s6  ;;  %s1409_s16 = int_to_ptr.vmem [resolvable:$true] %s645_s16 }
 0x23c   : > { %s1009_s18 = scalar_lea.vmem %s1409_s16, 256  ;;  %p1498_p0 = scmp.ne.s32.totalorder %s1492_s19, 0 }
 0x23d   : > { %p1010_p4 = scmp.ne.s32.totalorder %s1409_s16, %s1009_s18  ;;  %s1141_s28 = smov [#allocation6]  }
 0x23e   : > { %s1013_s27 = sshll.u32 %s1141_s28, 4  ;;  %s1014_s27 = int_to_ptr.vmem [resolvable:$false] %s1013_s27 }
 0x23f   : > { %p1011_p1 = pnand %p1010_p4, %p1498_p0  ;;  %s1015_s8 = scalar_lea.vmem %s1014_s27, 512 }
 0x240   : > { %s1406_s11 = scalar_lea.hbm %s1497_s12, %s781_s13  ;;  %p1016_p8 = scmp.lt.s32.totalorder %s1409_s16, %s1014_s27 }
 0x241   : > { %p1012_p5 = pneg %p1011_p1  ;;  %p1017_p3 = scmp.lt.s32.totalorder %s1015_s8, %s1009_s18 }
 0x243   : > { %p1018_p10 = por %p1017_p3, %p1016_p8 }
 0x245   : > { %p1019_p11 = pnand %p1018_p10, %p1012_p5 }
 0x247   : > { %1022 = shalt.err (!%p1019_p11)
}
 0x248   : > { %s1023_s6 = scalar_lea.hbm %s1406_s11, 256  ;;  %s1027_s13 = scalar_lea.hbm %s1497_s12, 512 }
 0x249   : > { %p1024_p6 = scmp.ne.s32.totalorder %s1406_s11, %s1023_s6  ;;  %p1028_p12 = scmp.lt.u32.totalorder %s1406_s11, %s1497_s12 }
 0x24a   : > { %p1029_p2 = scmp.lt.u32.totalorder %s1027_s13, %s1023_s6  ;;  %p1031_p4 = scmp.lt.u32.totalorder %s1023_s6, %s1406_s11 }
 0x24b   : > { %p1025_p9 = pnand %p1024_p6, %p1498_p0 }
 0x24c   : > { %p1030_p7 = por %p1029_p2, %p1028_p12 }
 0x24d   : > { %p1026_p13 = pneg %p1025_p9 }
 0x24e   : > { %p1032_p1 = por %p1031_p4, %p1030_p7 }
 0x250   : > { %p1033_p5 = pnand %p1032_p1, %p1026_p13 }
 0x252   : > { %1036 = shalt.err (!%p1033_p5)
}
 0x253   : > { %s1142_s18 = smov 64   ;;  %s1143_s28 = smov 128  }
 0x254   : > { %s1144_s27 = smov 4  }
 0x255   : > { %855 = dma.vmem_to_hbm [thread:$0]  (%p1498_p0), %s1409_s16, 256, %s1406_s11, %s1413_s17, %s1142_s18, %s1143_s28, %s1144_s27  }
 0x256 PF: > { %p866_p8 = scmp.ge.s32.totalorder %s1131_s7, 2  ;;  %s660_s8 = sand.u32 1, %s1091_s21  }
 0x257   : > { %p1499_p3 = scmp.ne.s32.totalorder %s1494_s10, 0  ;;  %s661_s6 = scalar_lea.sflag [#allocation5], %s660_s8 }
 0x259   : > { %p862_p10 = pnand %p866_p8, %p1499_p3 }
 0x25b   : > { %1086 = dma.done.wait (!%p862_p10), %s661_s6, 256  }
 0x25c   : > { %1088 = vsyncadd (!%p862_p10), %s661_s6, 4294967040  ;;  %s22_s7 = sadd.s32 1, %s1131_s7   ;;  %s1500_s20 = sld [smem:[#allocation11_spill]] }
 0x25d   : > { %p19_p11 = scmp.ge.s32.totalorder %s22_s7, 6   ;;  %s1501_s19 = smov %s1270_s24 }
 0x25e   : > { %s1502_s11 = sld [smem:[#allocation9_spill]]  ;;  %s1503_s16 = sld [smem:[#allocation10_spill]] }
 0x25f   : > { %s1504_s21 = smov %s1095_s22  ;;  %s1505_s22 = smov %s1099_s23 }
 0x260   : > { %s1507_s24 = smov %s1107_s25  ;;  %s1508_s25 = smov %s1111_s26 }
 0x261   : > { %s1509_s26 = smov %s1501_s19  ;;  %s1510_s27 = smov %s1123_s29 }
 0x262   : > { %s1506_s23 = smov %s1500_s20  ;;  %s1511_s28 = smov %s1127_s30 }
 0x263   :  { %21 = sbr.rel (!%p19_p11) target bundleno = 12 (0xc), region = 102 }
 0x264   : > { %s1512_s29 = smov %s1502_s11  ;;  %s1513_s30 = smov %s1503_s16 }
 0x26a   :  { %666 = vsyncpa [#allocation4], 1 }
 0x26b   :  { %668 = vsyncpa [#allocation4 + $0x1], 1 }
 0x26c   :  { %669 = vsyncpa [#allocation5], 1 }
 0x26d   :  { %671 = vsyncpa [#allocation5 + $0x1], 1 }

</bundles_post_ra>
